<compile_context>
chip_gen: v5e
topology: v5e:2x2
jax: 0.10.0
libtpu: 0.0.40
codegen_flags: <defaults>
</compile_context>

<pallas_src>
import jax
import jax.numpy as jnp
from jax.experimental import pallas as pl
from jax.experimental.pallas import tpu as pltpu

# ----------------------------- configuration -----------------------------
FC_SIZES = (16, 32, 32)        # fc_sizes
LATENT_SIZE = 8                # latent_size
NUM_COMPONENTS = 4             # num_components
LK = LATENT_SIZE * NUM_COMPONENTS       # 32
HEAD_W = 4 * LK                          # 128  (lane-dense head slab)
BATCH = 8
TAU = 0.1
NEG_SLOPE = 0.01               # nn.LeakyReLU default
KLD_EPS = 1e-5

IN_PAD = 32                    # feats padded 16 -> 32 so every packed weight shares in-dim 32
SLAB = 128                     # lane-dense output width

# packed weight/bias column offsets: [w0_pad | w1 | (wpm|wpv|wm|wlv) | wg]
OFF_W0 = 0
OFF_W1 = 32
OFF_HEADS = 64
W_COLS = OFF_HEADS + HEAD_W + NUM_COMPONENTS   # 196


def _leaky_relu(x):
    return jnp.where(x > 0, x, NEG_SLOPE * x)


# ------------------------------- kernel ----------------------------------
def gmmvae_kernel(x_ref, w_ref, b_ref, noise_ref, slab1_ref, slab2_ref):
    x = x_ref[...]          # (B, 32)   zero-padded feats
    W = w_ref[...]          # (32, 196) packed weights
    b = b_ref[...]          # (1, 196)  packed biases
    noise = noise_ref[...]  # (B, 128)  [eps(32) | gumbel(4) | 0 pad]

    # ---- fc = Sequential(FCBlock(fc_sizes), LeakyReLU()) : 2 linear layers ----
    h = jnp.dot(x, W[:, OFF_W0:OFF_W0 + 32],
                preferred_element_type=jnp.float32) + b[:, OFF_W0:OFF_W0 + 32]
    h = _leaky_relu(h)
    fc = jnp.dot(h, W[:, OFF_W1:OFF_W1 + 32],
                 preferred_element_type=jnp.float32) + b[:, OFF_W1:OFF_W1 + 32]
    fc = _leaky_relu(fc)

    # ---- fused heads: [prior_mean | prior_log_var | mean | log_var | gmm_logits] ----
    heads = jnp.dot(fc, W[:, OFF_HEADS:W_COLS],
                    preferred_element_type=jnp.float32) + b[:, OFF_HEADS:W_COLS]  # (B, 132)

    head_slab = heads[:, 0:SLAB]                          # lane-dense (B, 128)
    gmm_logits = heads[:, SLAB:SLAB + NUM_COMPONENTS]     # (B, 4)

    pm = heads[:, 0 * LK:1 * LK]
    plv = heads[:, 1 * LK:2 * LK]
    mu = heads[:, 2 * LK:3 * LK]
    lv = heads[:, 3 * LK:4 * LK]

    eps = noise[:, 0:LK]
    gum = noise[:, LK:LK + NUM_COMPONENTS]

    # ---- gumbel_softmax(tau=0.1, hard=True): forward value is one_hot(argmax).
    # Division by tau>0 is monotone -> dropped (zero numeric change to the one-hot).
    y = gmm_logits + gum
    y_max = jnp.max(y, axis=-1, keepdims=True)
    col = jax.lax.broadcasted_iota(jnp.int32, y.shape, 1)
    sentinel = jnp.int32(y.shape[-1])
    first_idx = jnp.min(jnp.where(y >= y_max, col, sentinel), axis=-1, keepdims=True)
    gmm_w = (col == first_idx).astype(jnp.float32)        # first-max tie-break (torch argmax)

    # ---- reparameterize (exp goes to EUP; free slot) ----
    sampled_h = eps * jnp.exp(0.5 * lv) + mu

    # ---- elementwise KLD loss ----
    loss = -0.5 * (1.0 + lv - plv
                   - (jnp.exp(lv) + (mu - pm) ** 2) / (jnp.exp(plv) + KLD_EPS))

    # ---- lane-dense stores: two full (B, 128) slabs, no masked partial stores ----
    slab1_ref[...] = head_slab
    pad = jnp.zeros((sampled_h.shape[0], SLAB - 2 * LK - NUM_COMPONENTS), jnp.float32)
    slab2_ref[...] = jnp.concatenate([sampled_h, loss, gmm_w, pad], axis=-1)


# --------------------------- params / packing ----------------------------
def init_params(key):
    """Deterministic parameter init (same fan-in scaling as nn.Linear default)."""
    def linear(k, fan_in, fan_out):
        kw, kb = jax.random.split(k)
        bound = 1.0 / jnp.sqrt(jnp.float32(fan_in))
        # stored as [in, out] (pre-transposed for x @ W)
        w = jax.random.uniform(kw, (fan_in, fan_out), jnp.float32, -bound, bound)
        b = jax.random.uniform(kb, (1, fan_out), jnp.float32, -bound, bound)
        return w, b

    keys = jax.random.split(key, 7)
    w0, b0 = linear(keys[0], FC_SIZES[0], FC_SIZES[1])
    w1, b1 = linear(keys[1], FC_SIZES[1], FC_SIZES[2])
    wpm, bpm = linear(keys[2], FC_SIZES[-1], LK)
    wpv, bpv = linear(keys[3], FC_SIZES[-1], LK)
    wm, bm = linear(keys[4], FC_SIZES[-1], LK)
    wlv, blv = linear(keys[5], FC_SIZES[-1], LK)
    wg, bg = linear(keys[6], FC_SIZES[-1], NUM_COMPONENTS)
    return (w0, b0, w1, b1, wpm, bpm, wpv, bpv, wm, bm, wlv, blv, wg, bg)


def pack_params(params):
    """Concatenate all weights/biases into one weight slab and one bias slab."""
    (w0, b0, w1, b1, wpm, bpm, wpv, bpv, wm, bm, wlv, blv, wg, bg) = params
    w0_pad = jnp.pad(w0, ((0, IN_PAD - w0.shape[0]), (0, 0)))          # (32, 32), zero rows
    packed_w = jnp.concatenate([w0_pad, w1, wpm, wpv, wm, wlv, wg], axis=1)   # (32, 196)
    packed_b = jnp.concatenate([b0, b1, bpm, bpv, bm, blv, bg], axis=1)       # (1, 196)
    return packed_w, packed_b


# ------------------------------- wrapper ----------------------------------
@jax.jit
def gmmvae_forward(feats, packed_w, packed_b, eps, gumbel):
    B = feats.shape[0]
    feats_pad = jnp.pad(feats, ((0, 0), (0, IN_PAD - feats.shape[1])))          # (B, 32)
    noise = jnp.concatenate(
        [eps, gumbel, jnp.zeros((B, SLAB - LK - NUM_COMPONENTS), jnp.float32)], axis=-1)  # (B, 128)

    vmem = pl.BlockSpec(memory_space=pltpu.MemorySpace.VMEM)
    slab1, slab2 = pl.pallas_call(
        gmmvae_kernel,
        out_shape=(jax.ShapeDtypeStruct((B, SLAB), jnp.float32),   # [pm|plv|mean|log_var]
                   jax.ShapeDtypeStruct((B, SLAB), jnp.float32)),  # [sampled_h|loss|gmm_w|pad]
        in_specs=[vmem, vmem, vmem, vmem],
        out_specs=(vmem, vmem),
    )(feats_pad, packed_w, packed_b, noise)

    return dict(
        prior_mean=slab1[:, 0 * LK:1 * LK],
        prior_log_var=slab1[:, 1 * LK:2 * LK],
        mean=slab1[:, 2 * LK:3 * LK],
        log_var=slab1[:, 3 * LK:4 * LK],
        sampled_h=slab2[:, 0:LK],
        loss=slab2[:, LK:2 * LK],
        gmm_weight=slab2[:, 2 * LK:2 * LK + NUM_COMPONENTS],
    )


# ------------------------------ reference ---------------------------------
def gmmvae_reference(feats, params, eps, gumbel):
    """Pure-JAX reference mirroring the PyTorch forward (unpacked params)."""
    (w0, b0, w1, b1, wpm, bpm, wpv, bpv, wm, bm, wlv, blv, wg, bg) = params
    h = _leaky_relu(feats @ w0 + b0)
    fc_out = _leaky_relu(h @ w1 + b1)
    prior_mean = fc_out @ wpm + bpm
    prior_log_var = fc_out @ wpv + bpv
    mean = fc_out @ wm + bm
    log_var = fc_out @ wlv + blv
    gmm_logits = fc_out @ wg + bg
    y = (gmm_logits + gumbel) / TAU
    gmm_weight = jax.nn.one_hot(jnp.argmax(y, axis=-1), NUM_COMPONENTS, dtype=jnp.float32)
    sampled_h = eps * jnp.exp(0.5 * log_var) + mean
    loss = -0.5 * (1 + log_var - prior_log_var
                   - (jnp.exp(log_var) + (mean - prior_mean) ** 2)
                   / (jnp.exp(prior_log_var) + KLD_EPS))
    return dict(prior_mean=prior_mean, prior_log_var=prior_log_var, mean=mean,
                log_var=log_var, sampled_h=sampled_h, gmm_weight=gmm_weight, loss=loss)


if __name__ == "__main__":
    key = jax.random.PRNGKey(0)
    k_feats, k_params, k_eps, k_gumbel = jax.random.split(key, 4)

    feats = jax.random.normal(k_feats, (BATCH, FC_SIZES[0]), jnp.float32)
    params = init_params(k_params)
    packed_w, packed_b = pack_params(params)
    eps = jax.random.normal(k_eps, (BATCH, LK), jnp.float32)
    gumbel = jax.random.gumbel(k_gumbel, (BATCH, NUM_COMPONENTS), jnp.float32)

    out = gmmvae_forward(feats, packed_w, packed_b, eps, gumbel)
    jax.block_until_ready(out)

    ref = gmmvae_reference(feats, params, eps, gumbel)
    for name in ref:
        assert jnp.allclose(out[name], ref[name], atol=1e-3, rtol=1e-3), name

    print("KERNEL_OK")
</pallas_src>

<mosaic_0001>
module attributes {stable_mosaic.version = 11 : i64} {
  func.func @gmmvae_kernel(%arg0: memref<8x32xf32, #tpu.memory_space<vmem>>, %arg1: memref<32x196xf32, #tpu.memory_space<vmem>>, %arg2: memref<1x196xf32, #tpu.memory_space<vmem>>, %arg3: memref<8x128xf32, #tpu.memory_space<vmem>>, %arg4: memref<8x128xf32, #tpu.memory_space<vmem>>, %arg5: memref<8x128xf32, #tpu.memory_space<vmem>>) attributes {dimension_semantics = [], scalar_prefetch = 0 : i64, scratch_operands = 0 : i64, tpu.core_type = #tpu.core_type<tc>} {
    %c0 = arith.constant 0 : index
    %c0_0 = arith.constant 0 : index
    %0 = vector.load %arg0[%c0, %c0_0] : memref<8x32xf32, #tpu.memory_space<vmem>>, vector<8x32xf32>
    %c0_1 = arith.constant 0 : index
    %c0_2 = arith.constant 0 : index
    %1 = vector.load %arg1[%c0_1, %c0_2] : memref<32x196xf32, #tpu.memory_space<vmem>>, vector<32x196xf32>
    %c0_3 = arith.constant 0 : index
    %c0_4 = arith.constant 0 : index
    %2 = vector.load %arg2[%c0_3, %c0_4] : memref<1x196xf32, #tpu.memory_space<vmem>>, vector<1x196xf32>
    %c0_5 = arith.constant 0 : index
    %c0_6 = arith.constant 0 : index
    %3 = vector.load %arg3[%c0_5, %c0_6] : memref<8x128xf32, #tpu.memory_space<vmem>>, vector<8x128xf32>
    %4 = vector.extract_strided_slice %1 {offsets = [0, 0], sizes = [32, 32], strides = [1, 1]} : vector<32x196xf32> to vector<32x32xf32>
    %cst = arith.constant dense<0.000000e+00> : vector<8x32xf32>
    %5 = tpu.matmul %0, %4, %cst {dimension_numbers = #tpu.dot_dimension_numbers<[1], [0], [0], [1], [0, 0, 1, 1], [], []>} : vector<8x32xf32>, vector<32x32xf32>, vector<8x32xf32> -> vector<8x32xf32>
    %6 = vector.extract_strided_slice %2 {offsets = [0, 0], sizes = [1, 32], strides = [1, 1]} : vector<1x196xf32> to vector<1x32xf32>
    %7 = vector.broadcast %6 : vector<1x32xf32> to vector<8x32xf32>
    %8 = arith.addf %5, %7 : vector<8x32xf32>
    %cst_7 = arith.constant 0.000000e+00 : f32
    %9 = vector.broadcast %cst_7 : f32 to vector<8x32xf32>
    %10 = arith.cmpf ogt, %8, %9 : vector<8x32xf32>
    %cst_8 = arith.constant 0.00999999977 : f32
    %11 = vector.broadcast %cst_8 : f32 to vector<8x32xf32>
    %12 = arith.mulf %11, %8 : vector<8x32xf32>
    %13 = arith.select %10, %8, %12 : vector<8x32xi1>, vector<8x32xf32>
    %14 = vector.extract_strided_slice %1 {offsets = [0, 32], sizes = [32, 32], strides = [1, 1]} : vector<32x196xf32> to vector<32x32xf32>
    %cst_9 = arith.constant dense<0.000000e+00> : vector<8x32xf32>
    %15 = tpu.matmul %13, %14, %cst_9 {dimension_numbers = #tpu.dot_dimension_numbers<[1], [0], [0], [1], [0, 0, 1, 1], [], []>} : vector<8x32xf32>, vector<32x32xf32>, vector<8x32xf32> -> vector<8x32xf32>
    %16 = vector.extract_strided_slice %2 {offsets = [0, 32], sizes = [1, 32], strides = [1, 1]} : vector<1x196xf32> to vector<1x32xf32>
    %17 = vector.broadcast %16 : vector<1x32xf32> to vector<8x32xf32>
    %18 = arith.addf %15, %17 : vector<8x32xf32>
    %cst_10 = arith.constant 0.000000e+00 : f32
    %19 = vector.broadcast %cst_10 : f32 to vector<8x32xf32>
    %20 = arith.cmpf ogt, %18, %19 : vector<8x32xf32>
    %cst_11 = arith.constant 0.00999999977 : f32
    %21 = vector.broadcast %cst_11 : f32 to vector<8x32xf32>
    %22 = arith.mulf %21, %18 : vector<8x32xf32>
    %23 = arith.select %20, %18, %22 : vector<8x32xi1>, vector<8x32xf32>
    %24 = vector.extract_strided_slice %1 {offsets = [0, 64], sizes = [32, 132], strides = [1, 1]} : vector<32x196xf32> to vector<32x132xf32>
    %cst_12 = arith.constant dense<0.000000e+00> : vector<8x132xf32>
    %25 = tpu.matmul %23, %24, %cst_12 {dimension_numbers = #tpu.dot_dimension_numbers<[1], [0], [0], [1], [0, 0, 1, 1], [], []>} : vector<8x32xf32>, vector<32x132xf32>, vector<8x132xf32> -> vector<8x132xf32>
    %26 = vector.extract_strided_slice %2 {offsets = [0, 64], sizes = [1, 132], strides = [1, 1]} : vector<1x196xf32> to vector<1x132xf32>
    %27 = vector.broadcast %26 : vector<1x132xf32> to vector<8x132xf32>
    %28 = arith.addf %25, %27 : vector<8x132xf32>
    %29 = vector.extract_strided_slice %28 {offsets = [0, 0], sizes = [8, 128], strides = [1, 1]} : vector<8x132xf32> to vector<8x128xf32>
    %30 = vector.extract_strided_slice %28 {offsets = [0, 128], sizes = [8, 4], strides = [1, 1]} : vector<8x132xf32> to vector<8x4xf32>
    %31 = vector.extract_strided_slice %28 {offsets = [0, 0], sizes = [8, 32], strides = [1, 1]} : vector<8x132xf32> to vector<8x32xf32>
    %32 = vector.extract_strided_slice %28 {offsets = [0, 32], sizes = [8, 32], strides = [1, 1]} : vector<8x132xf32> to vector<8x32xf32>
    %33 = vector.extract_strided_slice %28 {offsets = [0, 64], sizes = [8, 32], strides = [1, 1]} : vector<8x132xf32> to vector<8x32xf32>
    %34 = vector.extract_strided_slice %28 {offsets = [0, 96], sizes = [8, 32], strides = [1, 1]} : vector<8x132xf32> to vector<8x32xf32>
    %35 = vector.extract_strided_slice %3 {offsets = [0, 0], sizes = [8, 32], strides = [1, 1]} : vector<8x128xf32> to vector<8x32xf32>
    %36 = vector.extract_strided_slice %3 {offsets = [0, 32], sizes = [8, 4], strides = [1, 1]} : vector<8x128xf32> to vector<8x4xf32>
    %37 = arith.addf %30, %36 : vector<8x4xf32>
    %cst_13 = arith.constant dense<0xFF800000> : vector<8xf32>
    %38 = vector.multi_reduction <maximumf>, %37, %cst_13 [1] : vector<8x4xf32> to vector<8xf32>
    %39 = vector.shape_cast %38 : vector<8xf32> to vector<8x1xf32>
    %40 = tpu.iota {dimensions = array<i32: 1>} : vector<8x4xi32>
    %41 = vector.broadcast %39 : vector<8x1xf32> to vector<8x4xf32>
    %42 = arith.cmpf oge, %37, %41 : vector<8x4xf32>
    %c4_i32 = arith.constant 4 : i32
    %43 = vector.broadcast %c4_i32 : i32 to vector<8x4xi32>
    %44 = arith.select %42, %40, %43 : vector<8x4xi1>, vector<8x4xi32>
    %cst_14 = arith.constant dense<2147483647> : vector<8xi32>
    %45 = vector.multi_reduction <minsi>, %44, %cst_14 [1] : vector<8x4xi32> to vector<8xi32>
    %46 = vector.shape_cast %45 : vector<8xi32> to vector<8x1xi32>
    %47 = vector.broadcast %46 : vector<8x1xi32> to vector<8x4xi32>
    %48 = arith.cmpi eq, %40, %47 : vector<8x4xi32>
    %49 = arith.extui %48 : vector<8x4xi1> to vector<8x4xi32>
    %50 = arith.sitofp %49 : vector<8x4xi32> to vector<8x4xf32>
    %cst_15 = arith.constant 5.000000e-01 : f32
    %51 = vector.broadcast %cst_15 : f32 to vector<8x32xf32>
    %52 = arith.mulf %51, %34 : vector<8x32xf32>
    %53 = math.exp %52 : vector<8x32xf32>
    %54 = arith.mulf %35, %53 : vector<8x32xf32>
    %55 = arith.addf %54, %33 : vector<8x32xf32>
    %cst_16 = arith.constant 1.000000e+00 : f32
    %56 = vector.broadcast %cst_16 : f32 to vector<8x32xf32>
    %57 = arith.addf %56, %34 : vector<8x32xf32>
    %58 = arith.subf %57, %32 : vector<8x32xf32>
    %59 = math.exp %34 : vector<8x32xf32>
    %60 = arith.subf %33, %31 : vector<8x32xf32>
    %61 = arith.mulf %60, %60 : vector<8x32xf32>
    %62 = arith.addf %59, %61 : vector<8x32xf32>
    %63 = math.exp %32 : vector<8x32xf32>
    %cst_17 = arith.constant 9.99999974E-6 : f32
    %64 = vector.broadcast %cst_17 : f32 to vector<8x32xf32>
    %65 = arith.addf %63, %64 : vector<8x32xf32>
    %66 = arith.divf %62, %65 : vector<8x32xf32>
    %67 = arith.subf %58, %66 : vector<8x32xf32>
    %cst_18 = arith.constant -5.000000e-01 : f32
    %68 = vector.broadcast %cst_18 : f32 to vector<8x32xf32>
    %69 = arith.mulf %68, %67 : vector<8x32xf32>
    %c0_19 = arith.constant 0 : index
    %c0_20 = arith.constant 0 : index
    %70 = vector.load %arg4[%c0_19, %c0_20] : memref<8x128xf32, #tpu.memory_space<vmem>>, vector<8x128xf32>
    tpu.vector_store %arg4[%c0_19, %c0_20], %29 {strides = array<i32>} : memref<8x128xf32, #tpu.memory_space<vmem>>, vector<8x128xf32>,
    %cst_21 = arith.constant 0.000000e+00 : f32
    %71 = vector.broadcast %cst_21 : f32 to vector<8x60xf32>
    %72 = tpu.concatenate %55, %69, %50, %71 in 1 : vector<8x32xf32>, vector<8x32xf32>, vector<8x4xf32>, vector<8x60xf32> -> vector<8x128xf32>
    %c0_22 = arith.constant 0 : index
    %c0_23 = arith.constant 0 : index
    %73 = vector.load %arg5[%c0_22, %c0_23] : memref<8x128xf32, #tpu.memory_space<vmem>>, vector<8x128xf32>
    tpu.vector_store %arg5[%c0_22, %c0_23], %72 {strides = array<i32>} : memref<8x128xf32, #tpu.memory_space<vmem>>, vector<8x128xf32>,
    return
  }
}

</mosaic_0001>

<bundles_post_ra>
// kernel: gmmvae_forward.1
= control target key start
LH: loop header
LB: loop body
LE: loop exit
PB: predicated region body
PF: predicated region fallthrough
CT: control target
= control target key end

     0   :  { %11 = vsyncpa [#allocation3], 0  ;;  %s379_s21 = smov [#allocation2]   ;;  %s380_s23 = smov 256   ;;  %s465_s0 = inlined_call_operand.vmem [shape: f32[8,32], index: 0, kind: input, shape index: {}]   ;;  %s466_s1 = inlined_call_operand.hbm [shape: f32[32,196], index: 1, kind: input, shape index: {}]   ;;  %s467_s2 = inlined_call_operand.vmem [shape: f32[1,196], index: 2, kind: input, shape index: {}]   ;;  %s468_s3 = inlined_call_operand.vmem [shape: f32[8,128], index: 3, kind: input, shape index: {}]   ;;  %s469_s4 = inlined_call_operand.vmem [shape: f32[8,128], index: 4, kind: output, shape index: {0}]   ;;  %s470_s5 = inlined_call_operand.vmem [shape: f32[8,128], index: 5, kind: output, shape index: {1}]  }
   0x1   :  { %s18_s20 = sshll.u32 %s466_s1, 4  ;;  %s20_s22 = sshll.u32 %s379_s21, 4  ;;  %s19_s20 = int_to_ptr.hbm [resolvable:$true] %s18_s20  ;;  %s21_s22 = int_to_ptr.vmem [resolvable:$true] %s20_s22 }
   0x2   :  { %s381_s24 = smov 16  }
   0x3   :  { %26 = dma.hbm_to_vmem [thread:$0]  %s19_s20, 1024, %s21_s22, [#allocation3], %s380_s23, %s380_s23, %s381_s24  }
   0x4   :  { %377 = dma.done.wait [#allocation3], 1024  }
   0x5   :  { %378 = vsyncadd [#allocation3], 4294966272  ;;  %v42_v0 = vld [vmem:[#allocation2 + $0x30] sm:$0xff]  ;;  %v40_v1 = vld [vmem:[#allocation2 + $0x20] sm:$0xff]  ;;  %s382_s25 = smov 96   ;;  %vm49_vm0 = vcmask 261120  }
   0x6   :  { %65 = vmatpush.msra.mxu0 %v42_v0  ;;  %v317_v2 = vpack.i.bf16 %v40_v1, %v42_v0  ;;  %v38_v3 = vld [vmem:[#allocation2 + $0x10] sm:$0xff]  ;;  %v36_v4 = vld [vmem:[#allocation2] sm:$0xff]  ;;  %v41_v7 = vld [vmem:[#allocation2 + $0x28] sm:$0xff]  ;;  %s383_s27 = smov 64   ;;  %vm142_vm2 = vcmask 523264   ;;  %vm210_vm4 = vcmask 31744  }
   0x7   :  { %v35_v5 = vld [vmem:[%s465_s0] sm:$0xff]  ;;  %v322_v6 = vpack.i.bf16 %v36_v4, %v38_v3  ;;  %v43_v8 = vld [vmem:[#allocation2 + $0x38] sm:$0xff]  ;;  %v37_v10 = vld [vmem:[#allocation2 + $0x8] sm:$0xff]  ;;  %s384_s6 = smov 32   ;;  %vm293_vm12 = vcmask 556032  }
   0x8   :  { %66 = vmatpush.msra.mxu0 %v40_v1  ;;  %318 = vrot.lane.b32.xlu0 %v317_v2, %s382_s25  ;;  %v327_v9 = vpack.i.bf16 %v41_v7, %v43_v8  ;;  %v39_v11 = vld [vmem:[#allocation2 + $0x18] sm:$0xff]  ;;  %v44_v13 = vld [vmem:[%s467_s2] sm:$0x3] }
   0x9   :  { %v332_v12 = vpack.i.bf16 %v37_v10, %v39_v11  ;;  %v47_v14 = vperm.slane %v44_v13, 0  ;;  %v121_v41 = vperm.slane %v44_v13, 1  ;;  %v441_v42 = vld [vmem:[%s468_s3] sm:$0xff] }
   0xa   :  { %67 = vmatpush.msra.mxu0 %v38_v3  ;;  %328 = vrot.lane.b32.xlu1 %v327_v9, %s383_s27  ;;  %v214_v3 = vlaneseq }
   0xb   :  { %333 = vrot.lane.b32.xlu2 %v332_v12, %s383_s27 }
   0xc   :  { %68 = vmatpush.msra.mxu0 %v36_v4  ;;  %v215_v4 = vand.u32 127, %v214_v3 }
   0xd   :  { %305 = vmatmul.msk.f32.vlgmr.msra.gmra.mxu0 %vm49_vm0, %v35_v5 }
  0x10   :  { %323 = vrot.lane.b32.xlu0 %v322_v6, %s382_s25 }
  0x12   :  { %92 = vrot.lane.b32.xlu1 %v47_v14, %s382_s25 }
  0x13   :  { %338 = vrot.lane.b32.xlu2 %v317_v2, %s383_s27 }
  0x18   :  { %343 = vrot.lane.b32.xlu0 %v322_v6, %s383_s27 }
  0x1a   :  { %157 = vrot.lane.b32.xlu1 %v121_v41, %s383_s27 }
  0x1b   :  { %206 = vrot.lane.b32.xlu2 %v441_v42, %s382_s25 }
  0x22   :  { %155 = vrot.lane.b32.xlu1 %v47_v14, %s383_s27 }
  0x65   :  { %v334_v25 = vpop.permute.xlu2 %333 }
  0x66   :  { %v335_v37 = vunpack.i.l.bf16 %v334_v25  ;;  %v336_v39 = vunpack.i.h.bf16 %v334_v25 }
  0x6d   :  { %v339_v26 = vpop.permute.xlu2 %338 }
  0x6e   :  { %v341_v27 = vunpack.i.h.bf16 %v339_v26  ;;  %v340_v28 = vunpack.i.l.bf16 %v339_v26 }
  0x75   :  { %v207_v51 = vpop.permute.xlu2 %206 }
  0x7a   :  { %v319_v15 = vpop.permute.xlu0 %318 }
  0x7b   :  { %v320_v16 = vunpack.i.l.bf16 %v319_v15  ;;  %v321_v17 = vunpack.i.h.bf16 %v319_v15 }
  0x7c   :  { %v329_v29 = vpop.permute.xlu1 %328 }
  0x7d   :  { %110 = vmatpush.msra.mxu1 %v320_v16  ;;  %v330_v30 = vunpack.i.l.bf16 %v329_v29  ;;  %v331_v31 = vunpack.i.h.bf16 %v329_v29 }
  0x7f   :  { %111 = vmatpush.msra.mxu1 %v321_v17  ;;  %197 = vmatpush.msra.mxu3 %v330_v30  ;;  %v146_v32 = vsel %vm142_vm2, %v340_v28, %v330_v30  ;;  %v145_v33 = vsel %vm142_vm2, %v341_v27, %v331_v31 }
  0x80   :  { %177 = vmatpush.msra.mxu2 %v146_v32 }
  0x81   :  { %198 = vmatpush.msra.mxu3 %v331_v31 }
  0x82   :  { %v324_v18 = vpop.permute.xlu0 %323  ;;  %178 = vmatpush.msra.mxu2 %v145_v33 }
  0x83   :  { %v325_v19 = vunpack.i.l.bf16 %v324_v18  ;;  %v326_v20 = vunpack.i.h.bf16 %v324_v18  ;;  %199 = vmatpush.msra.mxu3 %v335_v37 }
  0x84   :  { %v93_v43 = vpop.permute.xlu1 %92 }
  0x85   :  { %112 = vmatpush.msra.mxu1 %v325_v19  ;;  %200 = vmatpush.msra.mxu3 %v336_v39 }
  0x87   :  { %113 = vmatpush.msra.mxu1 %v326_v20 }
  0x8a   :  { %v70_v21 = vpop.f32.mrf.mxu0  ;;  %v344_v34 = vpop.permute.xlu0 %343 }
  0x8b   :  { %v71_v22 = vadd.f32 %v70_v21, %v47_v14  ;;  %v345_v35 = vunpack.i.l.bf16 %v344_v34  ;;  %v346_v36 = vunpack.i.h.bf16 %v344_v34 }
  0x8c   :  { %v158_v48 = vpop.permute.xlu1 %157 }
  0x8d   :  { %v74_v23 = vmul.f32 0.01, %v71_v22  ;;  %vm73_vm1 = vcmp.gt.f32.partialorder %v71_v22, 0.0  ;;  %v144_v38 = vsel %vm142_vm2, %v345_v35, %v335_v37  ;;  %v143_v40 = vsel %vm142_vm2, %v346_v36, %v336_v39 }
  0x8e   :  { %179 = vmatpush.msra.mxu2 %v144_v38  ;;  %v385_v37 = vmov 0.0  }
  0x8f   :  { %v75_v24 = vsel %vm73_vm1, %v71_v22, %v74_v23 }
  0x90   :  { %306 = vmatmul.msk.f32.vlgmr.msra.gmra.mxu1 %vm49_vm0, %v75_v24  ;;  %180 = vmatpush.msra.mxu2 %v143_v40 }
  0x94   :  { %v156_v49 = vpop.permute.xlu1 %155 }
  0x95   :  { %v159_v50 = vsel %vm142_vm2, %v156_v49, %v158_v48 }
 0x10d   :  { %v115_v44 = vpop.f32.mrf.mxu1 }
 0x10e   :  { %v116_v45 = vadd.f32 %v115_v44, %v93_v43 }
 0x110   :  { %v119_v46 = vmul.f32 0.01, %v116_v45  ;;  %vm118_vm3 = vcmp.gt.f32.partialorder %v116_v45, 0.0 }
 0x112   :  { %v120_v47 = vsel %vm118_vm3, %v116_v45, %v119_v46 }
 0x113   :  { %307 = vmatmul.msk.f32.vlgmr.msra.gmra.mxu2 %vm49_vm0, %v120_v47  ;;  %308 = vmatmul.msk.f32.vlgmr.msra.gmra.mxu3 %vm49_vm0, %v120_v47 }
 0x196   :  { %v182_v52 = vpop.f32.mrf.mxu2  ;;  %v202_v53 = vpop.f32.mrf.mxu3 }
 0x197   :  { %v183_v54 = vadd.f32 %v182_v52, %v159_v50  ;;  %v203_v55 = vadd.f32 %v202_v53, %v158_v48 }
 0x199   :  { %282 = vst [vmem:[%s469_s4] sm:$0xff] %v183_v54  ;;  %v209_v56 = vadd.f32 %v207_v51, %v203_v55  ;;  %245 = vrot.lane.b32.xlu2 %v183_v54, %s383_s27  ;;  %v251_v57 = vmul.f32 1.442695, %v183_v54  ;;  %v236_v60 = vmul.f32 0.5, %v183_v54  ;;  %v249_v21 = vadd.f32 1.0, %v183_v54 }
 0x19b   :  { %v211_v58 = vsel %vm210_vm4, %v209_v56, -inf  ;;  %347 = vpow2.f32 %v251_v57  ;;  %v237_v62 = vmul.f32 1.442695, %v236_v60 }
 0x19c   :  { %212 = vmax.xlane.f32.xlu0 %v211_v58 }
 0x19d   :  { %349 = vpow2.f32 %v237_v62 }
 0x1a1   :  { %v348_v59 = vpop.eup %347 }
 0x1a2   :  { %v260_v61 = vadd.f32 1e-05, %v348_v59 }
 0x1a3   :  { %v350_v63 = vpop.eup %349 }
 0x1a4   :  { %262 = vrot.lane.b32.xlu2 %v260_v61, %s383_s27 }
 0x1b0   :  { %240 = vrot.lane.b32.xlu0 %v350_v63, %s384_s6 }
 0x1f3   :  { %v246_v0 = vpop.permute.xlu2 %245 }
 0x1f4   :  { %v253_v1 = vsub.f32 %v183_v54, %v246_v0  ;;  %v250_v24 = vsub.f32 %v249_v21, %v246_v0 }
 0x1f6   :  { %v254_v2 = vmul.f32 %v253_v1, %v253_v1 }
 0x1f8   :  { %256 = vrot.lane.b32.xlu2 %v254_v2, %s384_s6 }
 0x1fe   :  { %v263_v10 = vpop.permute.xlu2 %262 }
 0x1ff   :  { %351 = vrcp.f32 %v263_v10  ;;  %v276_v16 = vand.u32 2147483648, %v263_v10  ;;  %vm270_vm7 = vweird.f32 %v263_v10  ;;  %v274_v17 = vand.u32 2147483647, %v263_v10 }
 0x201   :  { %v277_v19 = vor.u32 1.1754944e-38, %v276_v16  ;;  %vm275_vm9 = vcmp.eq.f32.partialorder %v274_v17, 8.507059e+37 }
 0x205   :  { %v352_v11 = vpop.eup %351 }
 0x206   :  { %v266_v12 = vmul.f32 %v352_v11, %v263_v10  ;;  %vm271_vm6 = vweird.f32 %v352_v11 }
 0x207   :  { %vm272_vm8 = vmor %vm270_vm7, %vm271_vm6 }
 0x208   :  { %v267_v13 = vsub.f32 1.0, %v266_v12 }
 0x20a   :  { %v268_v14 = vmul.f32 %v352_v11, %v267_v13 }
 0x20c   :  { %v269_v15 = vadd.f32 %v352_v11, %v268_v14 }
 0x20e   :  { %v273_v18 = vsel %vm272_vm8, %v352_v11, %v269_v15 }
 0x20f   :  { %v213_v5 = vpop.xlane.xlu0 %212  ;;  %v278_v23 = vsel %vm275_vm9, %v277_v19, %v273_v18 }
 0x210   :  { %vm216_vm5 = vcmp.ge.f32.partialorder %v209_v56, %v213_v5 }
 0x211   :  { %v217_v6 = vsel %vm216_vm5, %v215_v4, 4 }
 0x212   :  { %v218_v7 = vsel %vm210_vm4, %v217_v6, 2147483647 }
 0x213   :  { %v220_v8 = vshra.s32 %v218_v7, 16  ;;  %v219_v28 = vand.u32 65535, %v218_v7 }
 0x215   :  { %v222_v9 = vcvt.s32.f32 %v220_v8  ;;  %v221_v30 = vcvt.s32.f32 %v219_v28 }
 0x217   :  { %223 = vmin.xlane.f32.xlu1 %v222_v9 }
 0x222   :  { %v241_v39 = vpop.permute.xlu0 %240 }
 0x223   :  { %v243_v40 = vmul.f32 %v241_v39, %v441_v42 }
 0x225   :  { %v248_v43 = vadd.f32 %v246_v0, %v243_v40 }
 0x252   :  { %v257_v20 = vpop.permute.xlu2 %256 }
 0x253   :  { %v259_v22 = vadd.f32 %v348_v59, %v257_v20 }
 0x255   :  { %v279_v25 = vmul.f32 %v278_v23, %v259_v22 }
 0x257   :  { %v280_v26 = vsub.f32 %v250_v24, %v279_v25 }
 0x259   :  { %v281_v27 = vmul.f32 -0.5, %v280_v26 }
 0x25b   :  { %284 = vrot.lane.b32.xlu1 %v281_v27, %s383_s27 }
 0x28a   :  { %v224_v29 = vpop.xlane.xlu1 %223 }
 0x28b   :  { %vm225_vm10 = vcmp.eq.f32.partialorder %v222_v9, %v224_v29  ;;  %v230_v32 = vcvt.f32.s32 %v224_v29 }
 0x28c   :  { %v226_v31 = vsel %vm225_vm10, %v221_v30, inf }
 0x28d   :  { %227 = vmin.xlane.f32.xlu2 %v226_v31  ;;  %v231_v34 = vshll.u32 %v230_v32, 16 }
 0x2cd   :  { %v285_v41 = vpop.permute.xlu1 %284 }
 0x2ce   :  { %v291_v44 = vsel %vm49_vm0, %v248_v43, %v285_v41 }
 0x300   :  { %v228_v33 = vpop.xlane.xlu2 %227 }
 0x301   :  { %v229_v35 = vcvt.f32.s32 %v228_v33 }
 0x303   :  { %v232_v36 = vadd.s32 %v231_v34, %v229_v35 }
 0x305   :  { %vm233_vm11 = vcmp.eq.s32.totalorder %v215_v4, %v232_v36 }
 0x306   :  { %v309_v38 = vsel %vm233_vm11, 1.0, %v385_v37 }
 0x307   :  { %288 = vrot.lane.b32.xlu0 %v309_v38, %s383_s27 }
 0x379   :  { %v289_v45 = vpop.permute.xlu0 %288 }
 0x37a   :  { %v292_v46 = vsel %vm142_vm2, %v291_v44, %v289_v45 }
 0x37b   :  { %v294_v47 = vsel %vm293_vm12, %v292_v46, 0.0 }
 0x37c   :  { %295 = vst [vmem:[%s470_s5] sm:$0xff] %v294_v47 }
 0x37d   :  { %304 = vsyncpa [#allocation3], 1 }

</bundles_post_ra>
